<compile_context>
chip_gen: v7x
topology: tpu7x:2x2x1
jax: 0.10.0
libtpu: 0.0.40
codegen_flags: <defaults>
</compile_context>

<pallas_src>
import functools

import jax
import jax.numpy as jnp
from jax.experimental import pallas as pl
from jax.experimental.pallas import tpu as pltpu

_LANES = 128  # TPU vreg lane width


def _mlp_kernel(x_ref, w1_ref, b1_ref, w2_ref, b2_ref, w3_ref, b3_ref, o_ref):
    # Entire forward pass for one batch tile, fully resident in VMEM.
    x = x_ref[...]                                                # bf16 [blk, in]

    h1 = jnp.dot(x, w1_ref[...], preferred_element_type=jnp.float32) + b1_ref[...]
    h1 = jnp.maximum(h1, 0.0).astype(jnp.bfloat16)                # ReLU (VPU)

    h2 = jnp.dot(h1, w2_ref[...], preferred_element_type=jnp.float32) + b2_ref[...]
    h2 = jnp.maximum(h2, 0.0).astype(jnp.bfloat16)                # ReLU (VPU)

    logits = jnp.dot(h2, w3_ref[...], preferred_element_type=jnp.float32) + b3_ref[...]
    # Stable sigmoid: clamp so exp(-z) can never overflow f32, then
    # exp on EUP + approximate reciprocal on EUP (VPU f32 divide avoided).
    z = jnp.clip(logits, -30.0, 30.0)
    out = pl.reciprocal(1.0 + jnp.exp(-z), approx=True)

    o_ref[...] = out.astype(o_ref.dtype)                          # lane-dense bf16 store


def _choose_block_b(B):
    # Small batches: one full-B grid step. Splitting (e.g. 2 x 8 rows at B=16)
    # costs ~0.35us per extra step and half-fills the 16-sublane bf16 vreg /
    # MXU pipeline for zero benefit on single-TC v5e/v6e; on v7x a second TC
    # only pays off once each shard is >= ~128 rows.
    if B <= 512:
        return B
    # Large batches: biggest tile <= 1024 rows that divides B (every candidate
    # is a multiple of 16); fewer grid steps amortize per-step DMA/setup cost
    # and HBM-roofline fraction keeps improving up to ~1024-row tiles.
    for cand in (1024, 512, 256, 128):
        if B % cand == 0:
            return cand
    return B  # awkward batch size: fall back to a single full-B step


def _vmem_limit_bytes(block_b, in_f, hid, out_p):
    # Generous estimate (everything assumed double-buffered) + headroom,
    # clamped to [32 MiB, 64 MiB] so it is valid on v5e/v6e/v7x alike.
    bf16, f32 = 2, 4
    est = (
        2 * block_b * in_f * bf16                       # x tile, double-buffered
        + 2 * (in_f * hid + hid * hid + hid * out_p) * bf16   # resident weights
        + 2 * (hid + hid + out_p) * f32                 # biases
        + 2 * block_b * out_p * bf16                    # output tile
    )
    return int(min(max(2 * est + (4 << 20), 32 << 20), 64 << 20))


def prepare_params(w1, b1, w2, b2, w3, b3):
    """One-time parameter preparation (do NOT repeat per forward call):
    - weights ([in, out] layout) cast to bf16 for the MXU,
    - biases cast to f32 and shaped [1, F],
    - last layer zero-padded up to a multiple of 128 lanes so the kernel's
      output stores are full unmasked vst's and the output DMA is lane-dense.
    Returns (params_tuple, out_f)."""
    hid = w1.shape[1]
    out_f = w3.shape[1]
    out_p = ((out_f + _LANES - 1) // _LANES) * _LANES

    w3p = jnp.zeros((hid, out_p), w3.dtype).at[:, :out_f].set(w3)
    b3p = jnp.zeros((1, out_p), b3.dtype).at[:, :out_f].set(b3.reshape(1, -1))

    params = (
        w1.astype(jnp.bfloat16),
        b1.reshape(1, -1).astype(jnp.float32),
        w2.astype(jnp.bfloat16),
        b2.reshape(1, -1).astype(jnp.float32),
        w3p.astype(jnp.bfloat16),
        b3p.astype(jnp.float32),
    )
    return params, out_f


@functools.partial(jax.jit, static_argnames=("out_f",))
def differential_detection_forward(x, params, *, out_f):
    w1b, b1f, w2b, b2f, w3b, b3f = params
    B, in_f = x.shape
    hid = w1b.shape[1]
    out_p = w3b.shape[1]

    block_b = _choose_block_b(B)
    assert B % block_b == 0
    grid = (B // block_b,)

    xb = x.astype(jnp.bfloat16)  # only per-call cast; weights are pre-prepared

    # Weights / biases: constant index_map -> resident in VMEM across grid
    # steps (no re-fetch). At hid <= ~1024 the (default double-buffered) bf16
    # weights are far below the VMEM limit; for much larger hidden sizes,
    # switch these specs to pipeline_mode=pl.Buffered(1) to halve the resident
    # weight footprint.
    full = lambda shape: pl.BlockSpec(shape, lambda i: (0, 0))

    out_padded = pl.pallas_call(
        _mlp_kernel,
        out_shape=jax.ShapeDtypeStruct((B, out_p), jnp.bfloat16),
        grid_spec=pltpu.PrefetchScalarGridSpec(
            num_scalar_prefetch=0,
            grid=grid,
            in_specs=[
                pl.BlockSpec((block_b, in_f), lambda i: (i, 0)),   # x tile (streamed)
                full((in_f, hid)),                                 # w1
                full((1, hid)),                                    # b1
                full((hid, hid)),                                  # w2
                full((1, hid)),                                    # b2
                full((hid, out_p)),                                # w3 (padded)
                full((1, out_p)),                                  # b3 (padded)
            ],
            out_specs=pl.BlockSpec((block_b, out_p), lambda i: (i, 0)),
        ),
        compiler_params=pltpu.CompilerParams(
            dimension_semantics=("parallel",),
            vmem_limit_bytes=_vmem_limit_bytes(block_b, in_f, hid, out_p),
        ),
    )(xb, w1b, b1f, w2b, b2f, w3b, b3f)

    # Slice padded lanes back to the real output width outside the kernel.
    # NOTE: padded output is bf16 (~3 significant decimal digits) to halve
    # HBM writeback; final cast restores the caller's dtype.
    return out_padded[:, :out_f].astype(x.dtype)


def _init_linear(key, fan_in, fan_out, dtype=jnp.float32):
    # Matches torch.nn.Linear default init: U(-1/sqrt(fan_in), 1/sqrt(fan_in)),
    # deterministic via jax.random. Weight stored as [in, out].
    kw, kb = jax.random.split(key)
    bound = 1.0 / jnp.sqrt(jnp.asarray(fan_in, dtype))
    w = jax.random.uniform(kw, (fan_in, fan_out), dtype, -bound, bound)
    b = jax.random.uniform(kb, (1, fan_out), dtype, -bound, bound)
    return w, b


def _reference_f32(x, w1, b1, w2, b2, w3, b3):
    h1 = jnp.maximum(x @ w1 + b1, 0.0)
    h2 = jnp.maximum(h1 @ w2 + b2, 0.0)
    return jax.nn.sigmoid(h2 @ w3 + b3)


def _reference_bf16(x, w1, b1, w2, b2, w3, b3):
    # Same bf16-operand / f32-accumulation math the kernel performs.
    bf, f32 = jnp.bfloat16, jnp.float32
    h1 = jnp.dot(x.astype(bf), w1.astype(bf), preferred_element_type=f32) + b1
    h1 = jnp.maximum(h1, 0.0)
    h2 = jnp.dot(h1.astype(bf), w2.astype(bf), preferred_element_type=f32) + b2
    h2 = jnp.maximum(h2, 0.0)
    logits = jnp.dot(h2.astype(bf), w3.astype(bf), preferred_element_type=f32) + b3
    return jax.nn.sigmoid(logits)


if __name__ == "__main__":
    # Small, TPU-tile-friendly shapes consistent with the module's MLP structure.
    batch, input_size, hidden_size, output_size = 16, 256, 128, 8

    key = jax.random.PRNGKey(0)
    kx, k1, k2, k3 = jax.random.split(key, 4)

    x = jax.random.normal(kx, (batch, input_size), jnp.float32)
    w1, b1 = _init_linear(k1, input_size, hidden_size)
    w2, b2 = _init_linear(k2, hidden_size, hidden_size)
    w3, b3 = _init_linear(k3, hidden_size, output_size)

    # One-time parameter prep (bf16 casts + lane-padding of the last layer).
    params, out_f = prepare_params(w1, b1, w2, b2, w3, b3)

    out = differential_detection_forward(x, params, out_f=out_f)
    out = jax.block_until_ready(out)
    assert out.shape == (batch, output_size)

    # Check against a reference doing the same bf16/f32 matmul math
    # (tolerance covers bf16 output rounding + approx reciprocal).
    ref_bf16 = _reference_bf16(x, w1, b1, w2, b2, w3, b3)
    assert jnp.allclose(out, ref_bf16, atol=1e-2, rtol=0), "mismatch vs bf16 reference"

    # Looser sanity check against the full-f32 reference (bf16 quantization error).
    ref_f32 = _reference_f32(x, w1, b1, w2, b2, w3, b3)
    assert jnp.allclose(out, ref_f32, atol=5e-2, rtol=0), "mismatch vs f32 reference"

    print("KERNEL_OK")
</pallas_src>

<mosaic_0001>
module attributes {stable_mosaic.version = 11 : i64} {
  func.func @_mlp_kernel(%arg0: i32, %arg1: memref<16x256xbf16, #tpu.memory_space<vmem>>, %arg2: memref<256x128xbf16, #tpu.memory_space<vmem>>, %arg3: memref<1x128xf32, #tpu.memory_space<vmem>>, %arg4: memref<128x128xbf16, #tpu.memory_space<vmem>>, %arg5: memref<1x128xf32, #tpu.memory_space<vmem>>, %arg6: memref<128x128xbf16, #tpu.memory_space<vmem>>, %arg7: memref<1x128xf32, #tpu.memory_space<vmem>>, %arg8: memref<16x128xbf16, #tpu.memory_space<vmem>>) attributes {dimension_semantics = [#tpu.dimension_semantics<parallel>], iteration_bounds = array<i64: 1>, scalar_prefetch = 0 : i64, scratch_operands = 0 : i64, tpu.core_type = #tpu.core_type<tc>, window_params = [{transform_indices = @transform_0, window_bounds = array<i64: 16, 256>}, {pipeline_mode = #tpu.pipeline_mode<synchronous>, transform_indices = @transform_1, window_bounds = array<i64: 256, 128>}, {pipeline_mode = #tpu.pipeline_mode<synchronous>, transform_indices = @transform_2, window_bounds = array<i64: 1, 128>}, {pipeline_mode = #tpu.pipeline_mode<synchronous>, transform_indices = @transform_3, window_bounds = array<i64: 128, 128>}, {pipeline_mode = #tpu.pipeline_mode<synchronous>, transform_indices = @transform_4, window_bounds = array<i64: 1, 128>}, {pipeline_mode = #tpu.pipeline_mode<synchronous>, transform_indices = @transform_5, window_bounds = array<i64: 128, 128>}, {pipeline_mode = #tpu.pipeline_mode<synchronous>, transform_indices = @transform_6, window_bounds = array<i64: 1, 128>}, {transform_indices = @transform_7, window_bounds = array<i64: 16, 128>}]} {
    %c0 = arith.constant 0 : index
    %c0_0 = arith.constant 0 : index
    %0 = vector.load %arg1[%c0, %c0_0] : memref<16x256xbf16, #tpu.memory_space<vmem>>, vector<16x256xbf16>
    %c0_1 = arith.constant 0 : index
    %c0_2 = arith.constant 0 : index
    %1 = vector.load %arg2[%c0_1, %c0_2] : memref<256x128xbf16, #tpu.memory_space<vmem>>, vector<256x128xbf16>
    %cst = arith.constant dense<0.000000e+00> : vector<16x128xf32>
    %2 = tpu.matmul %0, %1, %cst {dimension_numbers = #tpu.dot_dimension_numbers<[1], [0], [0], [1], [0, 0, 1, 1], [], []>} : vector<16x256xbf16>, vector<256x128xbf16>, vector<16x128xf32> -> vector<16x128xf32>
    %c0_3 = arith.constant 0 : index
    %c0_4 = arith.constant 0 : index
    %3 = vector.load %arg3[%c0_3, %c0_4] : memref<1x128xf32, #tpu.memory_space<vmem>>, vector<1x128xf32>
    %4 = vector.broadcast %3 : vector<1x128xf32> to vector<16x128xf32>
    %5 = arith.addf %2, %4 : vector<16x128xf32>
    %cst_5 = arith.constant 0.000000e+00 : f32
    %6 = vector.broadcast %cst_5 : f32 to vector<16x128xf32>
    %7 = arith.maximumf %5, %6 : vector<16x128xf32>
    %8 = arith.truncf %7 : vector<16x128xf32> to vector<16x128xbf16>
    %c0_6 = arith.constant 0 : index
    %c0_7 = arith.constant 0 : index
    %9 = vector.load %arg4[%c0_6, %c0_7] : memref<128x128xbf16, #tpu.memory_space<vmem>>, vector<128x128xbf16>
    %cst_8 = arith.constant dense<0.000000e+00> : vector<16x128xf32>
    %10 = tpu.matmul %8, %9, %cst_8 {dimension_numbers = #tpu.dot_dimension_numbers<[1], [0], [0], [1], [0, 0, 1, 1], [], []>} : vector<16x128xbf16>, vector<128x128xbf16>, vector<16x128xf32> -> vector<16x128xf32>
    %c0_9 = arith.constant 0 : index
    %c0_10 = arith.constant 0 : index
    %11 = vector.load %arg5[%c0_9, %c0_10] : memref<1x128xf32, #tpu.memory_space<vmem>>, vector<1x128xf32>
    %12 = vector.broadcast %11 : vector<1x128xf32> to vector<16x128xf32>
    %13 = arith.addf %10, %12 : vector<16x128xf32>
    %cst_11 = arith.constant 0.000000e+00 : f32
    %14 = vector.broadcast %cst_11 : f32 to vector<16x128xf32>
    %15 = arith.maximumf %13, %14 : vector<16x128xf32>
    %16 = arith.truncf %15 : vector<16x128xf32> to vector<16x128xbf16>
    %c0_12 = arith.constant 0 : index
    %c0_13 = arith.constant 0 : index
    %17 = vector.load %arg6[%c0_12, %c0_13] : memref<128x128xbf16, #tpu.memory_space<vmem>>, vector<128x128xbf16>
    %cst_14 = arith.constant dense<0.000000e+00> : vector<16x128xf32>
    %18 = tpu.matmul %16, %17, %cst_14 {dimension_numbers = #tpu.dot_dimension_numbers<[1], [0], [0], [1], [0, 0, 1, 1], [], []>} : vector<16x128xbf16>, vector<128x128xbf16>, vector<16x128xf32> -> vector<16x128xf32>
    %c0_15 = arith.constant 0 : index
    %c0_16 = arith.constant 0 : index
    %19 = vector.load %arg7[%c0_15, %c0_16] : memref<1x128xf32, #tpu.memory_space<vmem>>, vector<1x128xf32>
    %20 = vector.broadcast %19 : vector<1x128xf32> to vector<16x128xf32>
    %21 = arith.addf %18, %20 : vector<16x128xf32>
    %cst_17 = arith.constant -3.000000e+01 : f32
    %cst_18 = arith.constant 3.000000e+01 : f32
    %22 = vector.broadcast %cst_17 : f32 to vector<16x128xf32>
    %23 = arith.maximumf %22, %21 : vector<16x128xf32>
    %24 = vector.broadcast %cst_18 : f32 to vector<16x128xf32>
    %25 = arith.minimumf %24, %23 : vector<16x128xf32>
    %cst_19 = arith.constant 0.000000e+00 : f32
    %26 = vector.broadcast %cst_19 : f32 to vector<16x128xf32>
    %27 = arith.subf %26, %25 : vector<16x128xf32>
    %28 = math.exp %27 : vector<16x128xf32>
    %cst_20 = arith.constant 1.000000e+00 : f32
    %29 = vector.broadcast %cst_20 : f32 to vector<16x128xf32>
    %30 = arith.addf %29, %28 : vector<16x128xf32>
    %31 = tpu.reciprocal %30 {approx = true} : vector<16x128xf32> -> vector<16x128xf32>
    %32 = arith.truncf %31 : vector<16x128xf32> to vector<16x128xbf16>
    %c0_21 = arith.constant 0 : index
    %c0_22 = arith.constant 0 : index
    %33 = vector.load %arg8[%c0_21, %c0_22] : memref<16x128xbf16, #tpu.memory_space<vmem>>, vector<16x128xbf16>
    tpu.vector_store %arg8[%c0_21, %c0_22], %32 {strides = array<i32>} : memref<16x128xbf16, #tpu.memory_space<vmem>>, vector<16x128xbf16>,
    return
  }
  func.func @transform_0(%arg0: i32) -> (i32, i32) {
    %c0_i32 = arith.constant 0 : i32
    %c0_i32_0 = arith.constant 0 : i32
    return %arg0, %c0_i32 : i32, i32
  }
  func.func @transform_1(%arg0: i32) -> (i32, i32) {
    %c0_i32 = arith.constant 0 : i32
    %c0_i32_0 = arith.constant 0 : i32
    %c0_i32_1 = arith.constant 0 : i32
    return %c0_i32, %c0_i32_0 : i32, i32
  }
  func.func @transform_2(%arg0: i32) -> (i32, i32) {
    %c0_i32 = arith.constant 0 : i32
    %c0_i32_0 = arith.constant 0 : i32
    %c0_i32_1 = arith.constant 0 : i32
    return %c0_i32, %c0_i32_0 : i32, i32
  }
  func.func @transform_3(%arg0: i32) -> (i32, i32) {
    %c0_i32 = arith.constant 0 : i32
    %c0_i32_0 = arith.constant 0 : i32
    %c0_i32_1 = arith.constant 0 : i32
    return %c0_i32, %c0_i32_0 : i32, i32
  }
  func.func @transform_4(%arg0: i32) -> (i32, i32) {
    %c0_i32 = arith.constant 0 : i32
    %c0_i32_0 = arith.constant 0 : i32
    %c0_i32_1 = arith.constant 0 : i32
    return %c0_i32, %c0_i32_0 : i32, i32
  }
  func.func @transform_5(%arg0: i32) -> (i32, i32) {
    %c0_i32 = arith.constant 0 : i32
    %c0_i32_0 = arith.constant 0 : i32
    %c0_i32_1 = arith.constant 0 : i32
    return %c0_i32, %c0_i32_0 : i32, i32
  }
  func.func @transform_6(%arg0: i32) -> (i32, i32) {
    %c0_i32 = arith.constant 0 : i32
    %c0_i32_0 = arith.constant 0 : i32
    %c0_i32_1 = arith.constant 0 : i32
    return %c0_i32, %c0_i32_0 : i32, i32
  }
  func.func @transform_7(%arg0: i32) -> (i32, i32) {
    %c0_i32 = arith.constant 0 : i32
    %c0_i32_0 = arith.constant 0 : i32
    return %arg0, %c0_i32 : i32, i32
  }
}

</mosaic_0001>

<bundles_post_ra>
// kernel: differential_detection_forward.1
= control target key start
LH: loop header
LB: loop body
LE: loop exit
PB: predicated region body
PF: predicated region fallthrough
CT: control target
= control target key end

     0   :  { %12 = vsyncpa [#allocation3], 0  ;;  %s858_s0 = inlined_call_operand.vmem [shape: bf16[16,256], index: 0, kind: input, shape index: {}]   ;;  %s859_s1 = inlined_call_operand.hbm [shape: bf16[256,128], index: 1, kind: input, shape index: {}]   ;;  %s860_s2 = inlined_call_operand.vmem [shape: f32[1,128], index: 2, kind: input, shape index: {}]   ;;  %s861_s3 = inlined_call_operand.hbm [shape: bf16[128,128], index: 3, kind: input, shape index: {}]   ;;  %s862_s4 = inlined_call_operand.vmem [shape: f32[1,128], index: 4, kind: input, shape index: {}]   ;;  %s863_s5 = inlined_call_operand.vmem [shape: bf16[128,128], index: 5, kind: input, shape index: {}]   ;;  %s864_s6 = inlined_call_operand.vmem [shape: f32[1,128], index: 6, kind: input, shape index: {}]   ;;  %s865_s7 = inlined_call_operand.vmem [shape: bf16[16,128], index: 7, kind: output, shape index: {}]  }
   0x1   :  { %13 = vsyncpa [#allocation5], 0  ;;  %s728_s24 = smov [#allocation2]   ;;  %s680_s28 = scalar_lea.hbm %s859_s1, 2048 }
   0x2   :  { %s21_s25 = sshll.u32 %s728_s24, 4  ;;  %p681_p0 = scmp.ne.s32.totalorder %s859_s1, %s680_s28  ;;  %s22_s25 = int_to_ptr.vmem [resolvable:$true] %s21_s25 }
   0x3   :  { %p684_p1 = scmp.lt.u32.totalorder %s680_s28, %s859_s1 }
   0x5   :  { %p686_p2 = pnand %p684_p1, %p681_p0 }
   0x7   :  { %689 = shalt.err (!%p686_p2)
}
   0x8   :  { %s690_s10 = scalar_lea.vmem %s22_s25, 2048  ;;  %p695_p4 = scmp.lt.s32.totalorder %s22_s25, %s22_s25 }
   0x9   :  { %p691_p3 = scmp.ne.s32.totalorder %s22_s25, %s690_s10  ;;  %p696_p5 = scmp.lt.s32.totalorder %s690_s10, %s690_s10 }
   0xb   :  { %p697_p6 = por %p696_p5, %p695_p4 }
   0xd   :  { %p698_p7 = pnand %p697_p6, %p691_p3 }
   0xf   :  { %701 = shalt.err (!%p698_p7)
}
  0x10   :  { %s729_s11 = smov 64   ;;  %s730_s12 = smov 4  }
  0x11   :  { %27 = dma.hbm_to_vmem [thread:$0]  %s859_s1, 2048, %s22_s25, [#allocation3], %s729_s11, %s729_s11, %s730_s12  }
  0x12   :  { %s731_s15 = smov [#allocation4]   ;;  %s702_s19 = scalar_lea.hbm %s861_s3, 1024 }
  0x13   :  { %s35_s16 = sshll.u32 %s731_s15, 4  ;;  %p703_p8 = scmp.ne.s32.totalorder %s861_s3, %s702_s19  ;;  %s36_s16 = int_to_ptr.vmem [resolvable:$true] %s35_s16 }
  0x14   :  { %p706_p9 = scmp.lt.u32.totalorder %s702_s19, %s861_s3 }
  0x16   :  { %p708_p10 = pnand %p706_p9, %p703_p8 }
  0x18   :  { %711 = shalt.err (!%p708_p10)
}
  0x19   :  { %s712_s24 = scalar_lea.vmem %s36_s16, 1024  ;;  %p717_p12 = scmp.lt.s32.totalorder %s36_s16, %s36_s16 }
  0x1a   :  { %p713_p11 = scmp.ne.s32.totalorder %s36_s16, %s712_s24  ;;  %p718_p13 = scmp.lt.s32.totalorder %s712_s24, %s712_s24 }
  0x1c   :  { %p719_p0 = por %p718_p13, %p717_p12 }
  0x1e   :  { %p720_p1 = pnand %p719_p0, %p713_p11 }
  0x20   :  { %723 = shalt.err (!%p720_p1)
}
  0x21   :  { %41 = dma.hbm_to_vmem [thread:$0]  %s861_s3, 1024, %s36_s16, [#allocation5], %s729_s11, %s729_s11, %s730_s12  }
  0x22   :  { %724 = dma.done.wait [#allocation3], 2048  }
  0x23   :  { %725 = vsyncadd [#allocation3], 4294965248 }
  0x24   :  { %726 = dma.done.wait [#allocation5], 1024  }
  0x25   :  { %727 = vsyncadd [#allocation5], 4294966272  ;;  %v732_v0 = vmov 0.0   ;;  %v637_v1 = vld [vmem:[#allocation2 + $0x40] sm:$0xff]   ;;  %v639_v3 = vld [vmem:[#allocation2 + $0x48] sm:$0xff]   ;;  %vm733_vm0 = vmmov 0  }
  0x26   :  { %591 = vmatprep.subr.bf16.mxu1 %v732_v0  ;;  %v638_v2 = vld [vmem:[#allocation2] sm:$0xff]   ;;  %551 = vmatprep.subr.bf16.mxu0 %v637_v1  ;;  %v640_v4 = vld [vmem:[#allocation2 + $0x8] sm:$0xff]   ;;  %v641_v5 = vld [vmem:[#allocation2 + $0x50] sm:$0xff]  }
  0x27   :  { %552 = vmatpush3.bf16.msra.mxu0 %v638_v2  ;;  %v642_v6 = vld [vmem:[#allocation2 + $0x10] sm:$0xff]   ;;  %v643_v7 = vld [vmem:[#allocation2 + $0x58] sm:$0xff]   ;;  %v645_v9 = vld [vmem:[#allocation2 + $0x60] sm:$0xff]   ;;  %607 = vmatprep.mubr.msk.bf16.mxu1 %vm733_vm0, %v732_v0 }
  0x28   :  { %553 = vmatprep.subr.bf16.mxu0 %v639_v3  ;;  %v644_v8 = vld [vmem:[#allocation2 + $0x18] sm:$0xff]   ;;  %v646_v10 = vld [vmem:[#allocation2 + $0x20] sm:$0xff]   ;;  %v647_v11 = vld [vmem:[#allocation2 + $0x68] sm:$0xff]  }
  0x29   :  { %v648_v12 = vld [vmem:[#allocation2 + $0x28] sm:$0xff]   ;;  %v656_v14 = vld [vmem:[#allocation4] sm:$0xff]   ;;  %v649_v15 = vld [vmem:[#allocation2 + $0x70] sm:$0xff]  }
  0x2a   :  { %v655_v13 = vld [vmem:[%s858_s0 + $0x4] ss:$8 sps:$4 sm:$0xff]   ;;  %592 = vmatpush3.bf16.msra.mxu1 %v656_v14  ;;  %v650_v17 = vld [vmem:[#allocation2 + $0x30] sm:$0xff]   ;;  %v651_v18 = vld [vmem:[#allocation2 + $0x78] sm:$0xff]  }
  0x2b   :  { %554 = vmatpush3.bf16.msra.mxu0 %v640_v4  ;;  %234 = vmatprep.mubr.bf16.mxu0 %v655_v13  ;;  %v657_v16 = vld [vmem:[#allocation4 + $0x8] sm:$0xff]   ;;  %v658_v19 = vld [vmem:[#allocation4 + $0x10] sm:$0xff]   ;;  %v652_v20 = vld [vmem:[#allocation2 + $0x38] sm:$0xff]  }
  0x2c   :  { %555 = vmatprep.subr.bf16.mxu0 %v641_v5  ;;  %593 = vmatprep.subr.bf16.mxu1 %v732_v0  ;;  %v659_v21 = vld [vmem:[#allocation4 + $0x18] sm:$0xff]   ;;  %v653_v22 = vld [vmem:[%s858_s0] ss:$8 sps:$4 sm:$0xff]   ;;  %v662_v25 = vld [vmem:[#allocation4 + $0x30] sm:$0xff]  }
  0x2d   :  { %v660_v23 = vld [vmem:[#allocation4 + $0x20] sm:$0xff]   ;;  %v661_v24 = vld [vmem:[#allocation4 + $0x28] sm:$0xff]   ;;  %v663_v26 = vld [vmem:[#allocation4 + $0x38] sm:$0xff]  }
  0x2e   :  { %594 = vmatpush3.bf16.msra.mxu1 %v657_v16  ;;  %v664_v27 = vld [vmem:[%s863_s5] sm:$0xff]   ;;  %v665_v28 = vld [vmem:[%s863_s5 + $0x8] sm:$0xff]   ;;  %v666_v29 = vld [vmem:[%s863_s5 + $0x10] sm:$0xff]  }
  0x2f   :  { %556 = vmatpush3.bf16.msra.mxu0 %v642_v6  ;;  %595 = vmatprep.subr.bf16.mxu1 %v732_v0  ;;  %v667_v30 = vld [vmem:[%s863_s5 + $0x18] sm:$0xff]   ;;  %v668_v31 = vld [vmem:[%s863_s5 + $0x20] sm:$0xff]   ;;  %v669_v32 = vld [vmem:[%s863_s5 + $0x28] sm:$0xff]  }
  0x30   :  { %557 = vmatprep.subr.bf16.mxu0 %v643_v7  ;;  %v503_v34 = vld [vmem:[%s860_s2] ss:$0 sm:$0xff]  ;;  %v670_v45 = vld [vmem:[%s863_s5 + $0x30] sm:$0xff]   ;;  %v671_v46 = vld [vmem:[%s863_s5 + $0x38] sm:$0xff]  }
  0x31   :  { %v522_v47 = vld [vmem:[%s862_s4] ss:$0 sm:$0xff] }
  0x32   :  { %596 = vmatpush3.bf16.msra.mxu1 %v658_v19  ;;  %v531_v57 = vld [vmem:[%s864_s6] ss:$0 sm:$0xff] }
  0x33   :  { %558 = vmatpush3.bf16.msra.mxu0 %v644_v8  ;;  %597 = vmatprep.subr.bf16.mxu1 %v732_v0 }
  0x34   :  { %559 = vmatprep.subr.bf16.mxu0 %v645_v9 }
  0x36   :  { %598 = vmatpush3.bf16.msra.mxu1 %v659_v21 }
  0x37   :  { %560 = vmatpush3.bf16.msra.mxu0 %v646_v10  ;;  %599 = vmatprep.subr.bf16.mxu1 %v732_v0 }
  0x38   :  { %561 = vmatprep.subr.bf16.mxu0 %v647_v11 }
  0x3a   :  { %600 = vmatpush3.bf16.msra.mxu1 %v660_v23 }
  0x3b   :  { %562 = vmatpush3.bf16.msra.mxu0 %v648_v12  ;;  %601 = vmatprep.subr.bf16.mxu1 %v732_v0 }
  0x3c   :  { %563 = vmatprep.subr.bf16.mxu0 %v649_v15 }
  0x3e   :  { %602 = vmatpush3.bf16.msra.mxu1 %v661_v24 }
  0x3f   :  { %564 = vmatpush3.bf16.msra.mxu0 %v650_v17  ;;  %603 = vmatprep.subr.bf16.mxu1 %v732_v0 }
  0x40   :  { %565 = vmatprep.subr.bf16.mxu0 %v651_v18 }
  0x42   :  { %604 = vmatpush3.bf16.msra.mxu1 %v662_v25 }
  0x43   :  { %566 = vmatpush3.bf16.msra.mxu0 %v652_v20  ;;  %605 = vmatprep.subr.bf16.mxu1 %v732_v0 }
  0x44   :  { %611 = vmatprep.subr.bf16.mxu0 %v732_v0 }
  0x46   :  { %235 = vmatmul.mubr.bf16.vlgmr.msra.gmra.mrb[0].mxu0 %v653_v22  ;;  %606 = vmatpush3.bf16.msra.mxu1 %v663_v26 }
  0x47   :  { %627 = vmatprep.mubr.msk.bf16.mxu0 %vm733_vm0, %v732_v0  ;;  %612 = vmatpush3.bf16.msra.mxu0 %v664_v27 }
  0x48   :  { %613 = vmatprep.subr.bf16.mxu0 %v732_v0 }
  0x4b   :  { %614 = vmatpush3.bf16.msra.mxu0 %v665_v28 }
  0x4c   :  { %615 = vmatprep.subr.bf16.mxu0 %v732_v0 }
  0x4f   :  { %616 = vmatpush3.bf16.msra.mxu0 %v666_v29 }
  0x50   :  { %617 = vmatprep.subr.bf16.mxu0 %v732_v0 }
  0x53   :  { %618 = vmatpush3.bf16.msra.mxu0 %v667_v30 }
  0x54   :  { %619 = vmatprep.subr.bf16.mxu0 %v732_v0 }
  0x57   :  { %620 = vmatpush3.bf16.msra.mxu0 %v668_v31 }
  0x58   :  { %621 = vmatprep.subr.bf16.mxu0 %v732_v0 }
  0x5b   :  { %622 = vmatpush3.bf16.msra.mxu0 %v669_v32 }
  0x5c   :  { %623 = vmatprep.subr.bf16.mxu0 %v732_v0 }
  0x5f   :  { %624 = vmatpush3.bf16.msra.mxu0 %v670_v45 }
  0x60   :  { %625 = vmatprep.subr.bf16.mxu0 %v732_v0 }
  0x63   :  { %626 = vmatpush3.bf16.msra.mxu0 %v671_v46 }
 0x119   :  { %v567_v33 = vpop.f32.mrb[0].mxu0 }
 0x11a   :  { %v568_v35 = vpop.f32.mrb[1].mxu0 }
 0x11b   :  { %v569_v36 = vadd.f32 %v568_v35, %v567_v33  ;;  %v570_v37 = vpop.f32.mrb[2].mxu0 }
 0x11c   :  { %v571_v38 = vpop.f32.mrb[3].mxu0 }
 0x11d   :  { %v237_v39 = vadd.f32 %v569_v36, %v503_v34  ;;  %v572_v40 = vadd.f32 %v571_v38, %v570_v37 }
 0x11f   :  { %v240_v41 = vadd.f32 %v572_v40, %v503_v34  ;;  %v243_v42 = vmax.f32 %v237_v39, 0.0 }
 0x121   :  { %v244_v43 = vmax.f32 %v240_v41, 0.0 }
 0x123   :  { %v245_v44 = vpack.c.bf16 %v244_v43, %v243_v42 }
 0x125   :  { %608 = vmatmul.mubr.bf16.vlgmr.msra.gmra.mrb[0].mxu1 %v245_v44 }
 0x1f8   :  { %v351_v48 = vpop.f32.mrb[0].mxu1 }
 0x1f9   :  { %v352_v49 = vadd.f32 %v522_v47, %v351_v48  ;;  %v609_v50 = vpop.f32.mrb[1].mxu1 }
 0x1fa   :  { %v354_v51 = vpop.f32.mrb[2].mxu1 }
 0x1fb   :  { %v355_v52 = vadd.f32 %v522_v47, %v354_v51  ;;  %v610_v53 = vpop.f32.mrb[3].mxu1  ;;  %v358_v54 = vmax.f32 %v352_v49, 0.0 }
 0x1fd   :  { %v359_v55 = vmax.f32 %v355_v52, 0.0 }
 0x1ff   :  { %v360_v56 = vpack.c.bf16 %v359_v55, %v358_v54 }
 0x201   :  { %628 = vmatmul.mubr.bf16.vlgmr.msra.gmra.mrb[4].mxu0 %v360_v56 }
 0x2d4   :  { %v466_v58 = vpop.f32.mrb[4].mxu0 }
 0x2d5   :  { %v467_v59 = vadd.f32 %v531_v57, %v466_v58  ;;  %v629_v60 = vpop.f32.mrb[5].mxu0 }
 0x2d6   :  { %v469_v61 = vpop.f32.mrb[6].mxu0 }
 0x2d7   :  { %v540_v62 = vclamps-f32 %v467_v59, 30.0  ;;  %v470_v63 = vadd.f32 %v531_v57, %v469_v61  ;;  %v630_v0 = vpop.f32.mrb[7].mxu0 }
 0x2d9   :  { %v477_v1 = vsub.f32 0.0, %v540_v62  ;;  %v541_v2 = vclamps-f32 %v470_v63, 30.0 }
 0x2db   :  { %v479_v3 = vmul.f32 1.442695, %v477_v1  ;;  %v478_v4 = vsub.f32 0.0, %v541_v2 }
 0x2dd   :  { %672 = vpow2.f32 %v479_v3  ;;  %v481_v5 = vmul.f32 1.442695, %v478_v4 }
 0x2df   :  { %674 = vpow2.f32 %v481_v5 }
 0x2e7   :  { %v673_v6 = vpop.eup %672 }
 0x2e8   :  { %v483_v7 = vadd.f32 1.0, %v673_v6 }
 0x2e9   :  { %v675_v8 = vpop.eup %674 }
 0x2ea   :  { %v484_v9 = vadd.f32 1.0, %v675_v8  ;;  %676 = vrcp.f32 %v483_v7 }
 0x2ec   :  { %678 = vrcp.f32 %v484_v9 }
 0x2f4   :  { %v677_v10 = vpop.eup %676 }
 0x2f6   :  { %v679_v11 = vpop.eup %678 }
 0x2f7   :  { %v549_v12 = vpack.c.bf16 %v679_v11, %v677_v10 }
 0x2f9   :  { %550 = vst [vmem:[%s865_s7] sm:$0xff] %v549_v12  }
 0x2fa   :  { %501 = vsyncpa [#allocation3], 1 }
 0x2fb   :  { %502 = vsyncpa [#allocation5], 1 }

</bundles_post_ra>
